<compile_context>
chip_gen: v7x
topology: tpu7x:2x2x1
jax: 0.10.0
libtpu: 0.0.40
codegen_flags: <defaults>
</compile_context>

<pallas_src>
import jax
import jax.numpy as jnp
from jax.experimental import pallas as pl
from jax.experimental.pallas import tpu as pltpu

_LANES = 128
_MIB = 1024 * 1024


# --------------------------------------------------------------------------- #
# Kernel
# --------------------------------------------------------------------------- #
def _make_kernel(k: int):
    """Build the row-tile kernel for a given (static) feature count K."""
    n_groups = k // _LANES
    rem = k - n_groups * _LANES

    def kernel(x_ref, w_ref, b_ref, o_ref):
        # x_ref: (tm, K) VMEM     w_ref: (1, K) VMEM (resident across the grid)
        # b_ref: (1,)  SMEM f32   o_ref: (tm, 1) VMEM
        #
        # VALU-first / XLU-last reduction:
        #   * multiply 128-lane groups in the input dtype (bf16 VALU multiply
        #     on v6e/v7x; lowered via upcast on v5e),
        #   * accumulate elementwise into a (tm, 128) f32 accumulator (VALU),
        #   * one cross-lane (XLU) reduce at the end.
        # This bounds the f32 working set to a few (tm, 128) temps instead of a
        # full (tm, K) f32 cast of the tile.
        row = None
        if n_groups > 0:
            acc = None
            for g in range(n_groups):            # static, small trip count
                s = g * _LANES
                prod = (x_ref[:, s:s + _LANES] *
                        w_ref[:, s:s + _LANES]).astype(jnp.float32)
                acc = prod if acc is None else acc + prod
            row = jnp.sum(acc, axis=-1, keepdims=True)          # (tm, 1) f32
        if rem > 0:
            s = n_groups * _LANES
            tail = (x_ref[:, s:s + rem] *
                    w_ref[:, s:s + rem]).astype(jnp.float32)
            tail_sum = jnp.sum(tail, axis=-1, keepdims=True)    # (tm, 1) f32
            row = tail_sum if row is None else row + tail_sum

        b = b_ref[0]                                            # f32 scalar
        # NOTE: on the (masked) last row block the padded rows compute on stale
        # VMEM; safe because the op is per-row and only the valid window is
        # written back.
        o_ref[...] = jnp.maximum(row + b, 0.0).astype(o_ref.dtype)

    return kernel


# --------------------------------------------------------------------------- #
# Per-generation sizing
# --------------------------------------------------------------------------- #
def _device_kind() -> str:
    try:
        return jax.devices()[0].device_kind.lower()
    except Exception:
        return ""


def _vmem_limit_bytes() -> int:
    """Scoped VMEM limit: 64 MiB on 128-MiB chips (v5e/v6e), 44 MiB on v7x."""
    phys = None
    try:
        phys = int(pltpu.get_tpu_info().vmem_capacity_bytes)
    except Exception:
        phys = None
    if phys is None:
        phys = 64 * _MIB if "v7" in _device_kind() else 128 * _MIB
    if phys <= 64 * _MIB:
        return 44 * _MIB          # v7x: leave headroom on 64 MiB physical
    return 64 * _MIB              # v5e/v6e: 128 MiB physical


def _choose_row_tile(m: int, k: int, in_itemsize: int, out_itemsize: int,
                     vmem_limit: int, target_block: int = 8 * _MIB) -> int:
    """Largest row tile (~8 MiB of x) that fits the VMEM budget."""
    k_pad = -(-k // _LANES) * _LANES          # lane-padded K for VMEM sizing
    granule = 8 if in_itemsize >= 4 else 16   # bf16 packs 2 rows per sublane
    # Estimated VMEM bytes per row of one grid step:
    #   x double buffer                 2 * k_pad * in_itemsize
    #   (tm,1) output, lane-padded and double-buffered
    #   bounded f32 reduction temps     ~4 x 128 f32 per row
    per_row = (2 * k_pad * in_itemsize
               + 2 * _LANES * out_itemsize
               + 4 * _LANES * 4)
    budget = int(0.75 * vmem_limit)
    tm_fit = max(granule, budget // per_row)
    tm_target = max(granule, target_block // max(1, k_pad * in_itemsize))
    tm = min(tm_fit, tm_target)
    m_cap = -(-m // granule) * granule        # don't exceed (rounded-up) M
    tm = min(tm, m_cap)
    return max(granule, (tm // granule) * granule)


def _dimension_semantics_candidates():
    if "v7" in _device_kind():
        # v7x has 2 TensorCores per chip; plain "parallel" does not split the
        # grid across them.  Ask for an explicit core split, and fall back to
        # "parallel" if the lowering rejects it.
        return ((pltpu.CORE_PARALLEL,), ("parallel",))
    return (("parallel",),)


# --------------------------------------------------------------------------- #
# Wrapper
# --------------------------------------------------------------------------- #
def transformer_mask(x, weight, bias):
    """relu(x @ weight.T + bias); weight: (1, K), bias: (1,), x: (..., K)."""
    *lead, k = x.shape
    m = 1
    for d in lead:
        m *= d

    x2 = x.reshape(m, k)
    w = weight.reshape(1, k).astype(x.dtype)
    b = bias.reshape(1).astype(jnp.float32)

    in_itemsize = jnp.dtype(x.dtype).itemsize
    out_itemsize = in_itemsize
    vmem_limit = _vmem_limit_bytes()
    tm = _choose_row_tile(m, k, in_itemsize, out_itemsize, vmem_limit)
    grid = (pl.cdiv(m, tm),)

    # Advisory roofline numbers for XLA's scheduler (bandwidth-bound op).
    cost = pl.CostEstimate(
        flops=2 * m * k,
        transcendentals=0,
        bytes_accessed=m * k * in_itemsize + k * in_itemsize
        + m * out_itemsize + 4,
    )

    kernel = _make_kernel(k)

    def build(dim_sem):
        return pl.pallas_call(
            kernel,
            out_shape=jax.ShapeDtypeStruct((m, 1), x.dtype),
            grid_spec=pltpu.PrefetchScalarGridSpec(
                num_scalar_prefetch=0,
                grid=grid,
                in_specs=[
                    pl.BlockSpec((tm, k), lambda i: (i, 0)),            # x rows
                    pl.BlockSpec((1, k), lambda i: (0, 0)),             # weight
                    pl.BlockSpec(memory_space=pltpu.MemorySpace.SMEM),  # bias
                ],
                out_specs=pl.BlockSpec((tm, 1), lambda i: (i, 0)),
            ),
            compiler_params=pltpu.CompilerParams(
                dimension_semantics=dim_sem,
                vmem_limit_bytes=vmem_limit,
            ),
            cost_estimate=cost,
        )

    candidates = _dimension_semantics_candidates()
    out2 = None
    for idx, dim_sem in enumerate(candidates):
        try:
            out2 = build(dim_sem)(x2, w, b)
            break
        except Exception:
            if idx == len(candidates) - 1:
                raise
    return out2.reshape(*lead, 1)


# --------------------------------------------------------------------------- #
# Self-test
# --------------------------------------------------------------------------- #
if __name__ == "__main__":
    # Small shapes implied by the forward: (batch, seq, in_features).
    batch, seq, in_features = 2, 8, 32

    key = jax.random.PRNGKey(0)
    kx, kw, kb = jax.random.split(key, 3)

    x = jax.random.normal(kx, (batch, seq, in_features), dtype=jnp.float32)
    bound = 1.0 / (in_features ** 0.5)
    weight = jax.random.uniform(kw, (1, in_features), jnp.float32, -bound, bound)
    bias = jax.random.uniform(kb, (1,), jnp.float32, -bound, bound)

    out = jax.block_until_ready(transformer_mask(x, weight, bias))
    ref = jnp.maximum(x @ weight.T + bias, 0.0)
    assert out.shape == (batch, seq, 1)
    assert jnp.allclose(out, ref, atol=1e-5, rtol=1e-5)

    # Production-sized M: exercises multi-tile pipelining and a masked
    # (partial) last row block with the larger per-generation tiles.
    b2, s2, k2 = 4, 2500, 256          # M = 10000
    kx2, kw2, kb2 = jax.random.split(jax.random.PRNGKey(1), 3)
    x_big = jax.random.normal(kx2, (b2, s2, k2), dtype=jnp.float32)
    bound2 = 1.0 / (k2 ** 0.5)
    w_big = jax.random.uniform(kw2, (1, k2), jnp.float32, -bound2, bound2)
    b_big = jax.random.uniform(kb2, (1,), jnp.float32, -bound2, bound2)

    out_big = jax.block_until_ready(transformer_mask(x_big, w_big, b_big))
    ref_big = jnp.maximum(x_big @ w_big.T + b_big, 0.0)
    assert out_big.shape == (b2, s2, 1)
    assert jnp.allclose(out_big, ref_big, atol=2e-4, rtol=2e-4)

    # bf16 path: 16-row sublane granule, bf16 multiply with f32 accumulation,
    # and a K that is not a multiple of 128 (lane-tail group).
    b3, s3, k3 = 2, 512, 320
    kx3, kw3, kb3 = jax.random.split(jax.random.PRNGKey(2), 3)
    x_bf = jax.random.normal(kx3, (b3, s3, k3), jnp.float32).astype(jnp.bfloat16)
    bound3 = 1.0 / (k3 ** 0.5)
    w_bf = jax.random.uniform(kw3, (1, k3), jnp.float32,
                              -bound3, bound3).astype(jnp.bfloat16)
    b_bf = jax.random.uniform(kb3, (1,), jnp.float32, -bound3, bound3)

    out_bf = jax.block_until_ready(
        transformer_mask(x_bf, w_bf, b_bf.astype(jnp.bfloat16)))
    ref_bf = jnp.maximum(
        x_bf.astype(jnp.float32) @ w_bf.astype(jnp.float32).T + b_bf, 0.0)
    assert out_bf.shape == (b3, s3, 1)
    assert jnp.allclose(out_bf.astype(jnp.float32), ref_bf, atol=5e-2, rtol=5e-2)

    print("KERNEL_OK")
</pallas_src>

<mosaic_0001>
module attributes {stable_mosaic.version = 11 : i64} {
  func.func @kernel(%arg0: i32, %arg1: memref<16x32xf32, #tpu.memory_space<vmem>>, %arg2: memref<1x32xf32, #tpu.memory_space<vmem>>, %arg3: memref<1xf32, #tpu.memory_space<smem>>, %arg4: memref<16x1xf32, #tpu.memory_space<vmem>>) attributes {dimension_semantics = [#tpu.dimension_semantics<parallel>], iteration_bounds = array<i64: 1>, scalar_prefetch = 0 : i64, scratch_operands = 0 : i64, tpu.core_type = #tpu.core_type<tc>, window_params = [{transform_indices = @transform_0, window_bounds = array<i64: 16, 32>}, {pipeline_mode = #tpu.pipeline_mode<synchronous>, transform_indices = @transform_1, window_bounds = array<i64: 1, 32>}, {transform_indices = @transform_2, window_bounds = array<i64: 1>}, {transform_indices = @transform_3, window_bounds = array<i64: 16, 1>}]} {
    %c0 = arith.constant 0 : index
    %c0_0 = arith.constant 0 : index
    %0 = vector.load %arg1[%c0, %c0_0] : memref<16x32xf32, #tpu.memory_space<vmem>>, vector<16x32xf32>
    %c0_1 = arith.constant 0 : index
    %c0_2 = arith.constant 0 : index
    %1 = vector.load %arg2[%c0_1, %c0_2] : memref<1x32xf32, #tpu.memory_space<vmem>>, vector<1x32xf32>
    %2 = vector.broadcast %1 : vector<1x32xf32> to vector<16x32xf32>
    %3 = arith.mulf %0, %2 : vector<16x32xf32>
    %cst = arith.constant dense<0.000000e+00> : vector<16xf32>
    %4 = vector.multi_reduction <add>, %3, %cst [1] : vector<16x32xf32> to vector<16xf32>
    %5 = vector.shape_cast %4 : vector<16xf32> to vector<16x1xf32>
    %c0_3 = arith.constant 0 : index
    %6 = memref.load %arg3[%c0_3] : memref<1xf32, #tpu.memory_space<smem>>
    %7 = vector.broadcast %6 : f32 to vector<16x1xf32>
    %8 = arith.addf %5, %7 : vector<16x1xf32>
    %cst_4 = arith.constant 0.000000e+00 : f32
    %9 = vector.broadcast %cst_4 : f32 to vector<16x1xf32>
    %10 = arith.maximumf %8, %9 : vector<16x1xf32>
    %c0_5 = arith.constant 0 : index
    %c0_6 = arith.constant 0 : index
    %11 = vector.load %arg4[%c0_5, %c0_6] : memref<16x1xf32, #tpu.memory_space<vmem>>, vector<16x1xf32>
    tpu.vector_store %arg4[%c0_5, %c0_6], %10 {strides = array<i32>} : memref<16x1xf32, #tpu.memory_space<vmem>>, vector<16x1xf32>,
    return
  }
  func.func @transform_0(%arg0: i32) -> (i32, i32) {
    %c0_i32 = arith.constant 0 : i32
    %c0_i32_0 = arith.constant 0 : i32
    return %arg0, %c0_i32 : i32, i32
  }
  func.func @transform_1(%arg0: i32) -> (i32, i32) {
    %c0_i32 = arith.constant 0 : i32
    %c0_i32_0 = arith.constant 0 : i32
    %c0_i32_1 = arith.constant 0 : i32
    return %c0_i32, %c0_i32_0 : i32, i32
  }
  func.func @transform_2(%arg0: i32) -> i32 {
    %c0_i32 = arith.constant 0 : i32
    %c0_i32_0 = arith.constant 0 : i32
    return %c0_i32 : i32
  }
  func.func @transform_3(%arg0: i32) -> (i32, i32) {
    %c0_i32 = arith.constant 0 : i32
    %c0_i32_0 = arith.constant 0 : i32
    return %arg0, %c0_i32 : i32, i32
  }
}

</mosaic_0001>

<bundles_post_ra>
// kernel: tpu_custom_call.1
= control target key start
LH: loop header
LB: loop body
LE: loop exit
PB: predicated region body
PF: predicated region fallthrough
CT: control target
= control target key end

     0   :  { %9 = vsyncpa [#allocation4], 0  ;;  %s235_s0 = inlined_call_operand.hbm [shape: f32[16,32], index: 0, kind: input, shape index: {}]   ;;  %s236_s1 = inlined_call_operand.hbm [shape: f32[1,32], index: 1, kind: input, shape index: {}]   ;;  %s237_s2 = inlined_call_operand.<no memory space> [shape: f32[1], index: 2, kind: input, shape index: {}]   ;;  %s238_s3 = inlined_call_operand.hbm [shape: f32[16,1], index: 3, kind: output, shape index: {}]  }
   0x1   :  { %10 = vsyncpa [#allocation7], 0 }
   0x2   :  { %11 = vsyncpa [#allocation5], 0  ;;  %s165_s12 = smov [#allocation3]   ;;  %s93_s16 = scalar_lea.hbm %s235_s0, 256 }
   0x3   :  { %s17_s13 = sshll.u32 %s165_s12, 4  ;;  %p94_p0 = scmp.ne.s32.totalorder %s235_s0, %s93_s16  ;;  %s18_s13 = int_to_ptr.vmem [resolvable:$true] %s17_s13 }
   0x4   :  { %p97_p1 = scmp.lt.u32.totalorder %s93_s16, %s235_s0 }
   0x6   :  { %p99_p2 = pnand %p97_p1, %p94_p0 }
   0x8   :  { %102 = shalt.err (!%p99_p2)
}
   0x9   :  { %s103_s21 = scalar_lea.vmem %s18_s13, 256  ;;  %p108_p4 = scmp.lt.s32.totalorder %s18_s13, %s18_s13 }
   0xa   :  { %p104_p3 = scmp.ne.s32.totalorder %s18_s13, %s103_s21  ;;  %p109_p5 = scmp.lt.s32.totalorder %s103_s21, %s103_s21 }
   0xc   :  { %p110_p6 = por %p109_p5, %p108_p4 }
   0xe   :  { %p111_p7 = pnand %p110_p6, %p104_p3 }
  0x10   :  { %114 = shalt.err (!%p111_p7)
}
  0x11   :  { %s166_s22 = smov 128   ;;  %s167_s23 = smov 8  }
  0x12   :  { %23 = dma.hbm_to_vmem [thread:$0]  %s235_s0, 256, %s18_s13, [#allocation4], %s166_s22, %s166_s22, %s167_s23  }
  0x13   :  { %s168_s26 = smov [#allocation6]   ;;  %s115_s30 = scalar_lea.hbm %s236_s1, 16 }
  0x14   :  { %s30_s27 = sshll.u32 %s168_s26, 4  ;;  %p116_p8 = scmp.ne.s32.totalorder %s236_s1, %s115_s30  ;;  %s31_s27 = int_to_ptr.vmem [resolvable:$true] %s30_s27 }
  0x15   :  { %p119_p9 = scmp.lt.u32.totalorder %s115_s30, %s236_s1 }
  0x17   :  { %p121_p10 = pnand %p119_p9, %p116_p8 }
  0x19   :  { %124 = shalt.err (!%p121_p10)
}
  0x1a   :  { %s125_s8 = scalar_lea.vmem %s31_s27, 16  ;;  %s129_s0 = scalar_lea.vmem %s31_s27, 32 }
  0x1b   :  { %p126_p11 = scmp.ne.s32.totalorder %s31_s27, %s125_s8  ;;  %p130_p12 = scmp.lt.s32.totalorder %s31_s27, %s31_s27 }
  0x1c   :  { %p131_p13 = scmp.lt.s32.totalorder %s129_s0, %s125_s8 }
  0x1e   :  { %p132_p0 = por %p131_p13, %p130_p12 }
  0x20   :  { %p133_p1 = pnand %p132_p0, %p126_p11 }
  0x22   :  { %136 = shalt.err (!%p133_p1)
}
  0x23   :  { %33 = dma.hbm_to_vmem [thread:$0]  %s236_s1, 16, %s31_s27, [#allocation7]  }
  0x24   :  { %159 = dma.done.wait [#allocation4], 256  }
  0x25   :  { %160 = vsyncadd [#allocation4], 4294967040 }
  0x26   :  { %161 = dma.done.wait [#allocation7], 16  }
  0x27   :  { %162 = vsyncadd [#allocation7], 4294967280  ;;  %v42_v0 = vld [vmem:[#allocation3] sm:$0xff]  ;;  %v87_v1 = vld [vmem:[#allocation6] ss:$0 sm:$0xff]  ;;  %vm53_vm0 = vcmask 261120   ;;  %v61_v7 = vstv %s237_s2 }
  0x28   :  { %v43_v2 = vld [vmem:[#allocation3 + $0x8] sm:$0xff]  ;;  %v51_v3 = vmul.f32 %v87_v1, %v42_v0  ;;  %vm66_vm1 = vcmask 7168   ;;  %s169_s1 = smov [#allocation8]  }
  0x29   :  { %v52_v4 = vmul.f32 %v87_v1, %v43_v2  ;;  %s74_s13 = sshll.u32 %s169_s1, 4  ;;  %s75_s13 = int_to_ptr.vmem [resolvable:$true] %s74_s13 }
  0x2a   :  { %v54_v5 = vsel %vm53_vm0, %v51_v3, 0.0  ;;  %s137_s14 = scalar_lea.vmem %s75_s13, 256  ;;  %p142_p3 = scmp.lt.s32.totalorder %s75_s13, %s75_s13 }
  0x2b   :  { %55 = vadd.xlane.f32.xlu0 %v54_v5  ;;  %v57_v6 = vsel %vm53_vm0, %v52_v4, 0.0  ;;  %p138_p2 = scmp.ne.s32.totalorder %s75_s13, %s137_s14  ;;  %p143_p4 = scmp.lt.s32.totalorder %s137_s14, %s137_s14 }
  0x2d   :  { %p144_p5 = por %p143_p4, %p142_p3 }
  0x2f   :  { %58 = vadd.xlane.f32.xlu0 %v57_v6  ;;  %p145_p6 = pnand %p144_p5, %p138_p2 }
  0xb8   :  { %v56_v8 = vpop.xlane.xlu0 %55 }
  0xb9   :  { %v62_v9 = vadd.f32 %v61_v7, %v56_v8 }
  0xbb   :  { %v64_v10 = vmax.f32 %v62_v9, 0.0 }
  0xbc   :  { %v59_v11 = vpop.xlane.xlu0 %58 }
  0xbd   :  { %v63_v12 = vadd.f32 %v61_v7, %v59_v11  ;;  %67 = vst.msk [vmem:[#allocation8] sm:$0xff] %vm66_vm1, %v64_v10 }
  0xbf   :  { %v65_v13 = vmax.f32 %v63_v12, 0.0 }
  0xc1   :  { %68 = vst.msk [vmem:[#allocation8 + $0x8] sm:$0xff] %vm66_vm1, %v65_v13 }
  0xc2   :  { %148 = shalt.err (!%p145_p6)
}
  0xc3   :  { %s149_s16 = scalar_lea.hbm %s238_s3, 256 }
  0xc4   :  { %p150_p7 = scmp.ne.s32.totalorder %s238_s3, %s149_s16  ;;  %p153_p8 = scmp.lt.u32.totalorder %s149_s16, %s238_s3 }
  0xc6   :  { %p155_p9 = pnand %p153_p8, %p150_p7 }
  0xc8   :  { %158 = shalt.err (!%p155_p9)
}
  0xc9   :  { %80 = dma.vmem_to_hbm [thread:$0]  %s75_s13, 256, %s238_s3, [#allocation5], %s166_s22, %s166_s22, %s167_s23  }
  0xca   :  { %163 = dma.done.wait [#allocation5], 256  }
  0xcb   :  { %164 = vsyncadd [#allocation5], 4294967040 }
  0xcc   :  { %84 = vsyncpa [#allocation4], 1 }
  0xcd   :  { %85 = vsyncpa [#allocation7], 1 }
  0xce   :  { %86 = vsyncpa [#allocation5], 1 }

</bundles_post_ra>
